<compile_context>
chip_gen: v7x
topology: tpu7x:2x2x1
jax: 0.10.0
libtpu: 0.0.40
codegen_flags: <defaults>
</compile_context>

<pallas_src>
import jax
import jax.numpy as jnp
from jax.experimental import pallas as pl
from jax.experimental.pallas import tpu as pltpu

PROCESS_HISTORY = 2
FEAT = 2                 # env.feat = mv(1) + pv(1) + dev(0)
STATE_DIM = FEAT         # env.observation_space.shape[0]
ACTION_DIM = 1           # env.action_space.shape[0]
S_IN = PROCESS_HISTORY * STATE_DIM            # 4
IN_DIM = S_IN + ACTION_DIM                    # 5
H1, H2, OUT = 64, 32, 1
FH1, FH2, FOUT = 2 * H1, 2 * H2, 2 * OUT      # fused: 128, 64, 2


def _critic_fused_kernel(st_ref, a_ref,
                         w1s_ref, w1a_ref, b1_ref,
                         w2_ref, b2_ref,
                         w3_ref, b3_ref,
                         q1_ref, q2_ref):
    st = st_ref[...]                                   # (TB, 4)
    a = a_ref[...]                                     # (TB, 1)
    w1s = w1s_ref[...]                                 # (4, 128)

    # Layer 1 entirely on the VPU (K=4 is far too shallow for the MXU):
    #   h = b1 + a*w1a + sum_k st[:, k] * w1s[k, :]    -> (TB, 128)
    h = b1_ref[...] + a * w1a_ref[...]
    for k in range(S_IN):                              # static unroll (4 FMAs)
        h = h + st[:, k:k + 1] * w1s[k:k + 1, :]
    h = jnp.maximum(h, 0.0)

    # Layer 2 (block-diagonal, MXU): (TB,128)@(128,64)
    h = jnp.dot(h, w2_ref[...], preferred_element_type=jnp.float32) + b2_ref[...]
    h = jnp.maximum(h, 0.0)

    # Layer 3 (block-diagonal, MXU): (TB,64)@(64,2) -> [q1 | q2]
    q = jnp.dot(h, w3_ref[...], preferred_element_type=jnp.float32) + b3_ref[...]
    q1_ref[...] = q[:, 0:1]
    q2_ref[...] = q[:, 1:2]


def pack_params(params):
    """Pack per-layer params into fused block-diagonal weights.
    Call ONCE per parameter update (outside the forward), not per call."""
    f32 = jnp.float32
    w1f = jnp.concatenate([params["w1"], params["w4"]], axis=1)      # (5, 128)
    packed = {
        "w1s": w1f[:S_IN],                                           # (4, 128)
        "w1a": w1f[S_IN:],                                           # (1, 128)
        "b1": jnp.concatenate([params["b1"], params["b4"]], 1),      # (1, 128)
        "w2": jnp.block([
            [params["w2"], jnp.zeros((H1, H2), f32)],
            [jnp.zeros((H1, H2), f32), params["w5"]],
        ]),                                                          # (128, 64)
        "b2": jnp.concatenate([params["b2"], params["b5"]], 1),      # (1, 64)
        "w3": jnp.block([
            [params["w3"], jnp.zeros((H2, OUT), f32)],
            [jnp.zeros((H2, OUT), f32), params["w6"]],
        ]),                                                          # (64, 2)
        "b3": jnp.concatenate([params["b3"], params["b6"]], 1),      # (1, 2)
    }
    return {k: v.astype(f32) for k, v in packed.items()}


def critic_forward(state, action, fused, *, tile_b=2048):
    """state: (B, PROCESS_HISTORY, FEAT) f32; action: (B, ACTION_DIM) f32;
    fused: output of pack_params.  Returns (q1, q2), each (B, 1) f32."""
    B = state.shape[0]
    st = state.reshape(B, S_IN).astype(jnp.float32)   # contiguous view, no copy
    a = action.astype(jnp.float32)

    # Batch tiling (no padding: Pallas handles the ragged final block;
    # OOB output rows are dropped and rows are independent).
    desired = max(8, int(tile_b))
    if B <= 2 * desired:
        # split into ~2 tiles so both TensorCores are used on v7x
        tb = max(8, ((-(-B // 2) + 7) // 8) * 8)
    else:
        tb = desired
    n_tiles = pl.cdiv(B, tb)

    flops = 2 * B * (IN_DIM * FH1 + FH1 * FH2 + FH2 * FOUT)
    bytes_accessed = 4 * (B * (S_IN + ACTION_DIM + FOUT)
                          + (S_IN + 1 + 1) * FH1
                          + (FH1 + 1) * FH2
                          + (FH2 + 1) * FOUT)

    def data_spec(cols):
        return pl.BlockSpec((tb, cols), lambda i: (i, 0))

    def weight_spec(shape):
        # Constant index_map -> block is revisited every grid step; Mosaic
        # keeps it VMEM-resident (no per-step DMA re-issue needed).
        return pl.BlockSpec(shape, lambda i: (0, 0))

    q1, q2 = pl.pallas_call(
        _critic_fused_kernel,
        out_shape=(jax.ShapeDtypeStruct((B, OUT), jnp.float32),
                   jax.ShapeDtypeStruct((B, OUT), jnp.float32)),
        grid=(n_tiles,),
        in_specs=[
            data_spec(S_IN),                 # state tile
            data_spec(ACTION_DIM),           # action tile
            weight_spec((S_IN, FH1)),        # w1 (state rows)
            weight_spec((ACTION_DIM, FH1)),  # w1 (action row)
            weight_spec((1, FH1)),           # b1
            weight_spec((FH1, FH2)),         # w2 (block-diag)
            weight_spec((1, FH2)),           # b2
            weight_spec((FH2, FOUT)),        # w3 (block-diag)
            weight_spec((1, FOUT)),          # b3
        ],
        out_specs=(data_spec(OUT), data_spec(OUT)),
        compiler_params=pltpu.CompilerParams(
            dimension_semantics=("parallel",),
            vmem_limit_bytes=32 * 1024 * 1024,
        ),
        cost_estimate=pl.CostEstimate(
            flops=flops, transcendentals=0, bytes_accessed=bytes_accessed),
    )(st, a,
      fused["w1s"], fused["w1a"], fused["b1"],
      fused["w2"], fused["b2"],
      fused["w3"], fused["b3"])

    return q1, q2


def init_params(key):
    """Deterministic init mimicking PyTorch nn.Linear default:
    U(-1/sqrt(fan_in), 1/sqrt(fan_in)) for both weight and bias.
    Weights stored as (in, out); loading real PyTorch checkpoints would
    require transposing the (out, in) tensors."""
    dims = [(IN_DIM, H1), (H1, H2), (H2, OUT),   # l1, l2, l3
            (IN_DIM, H1), (H1, H2), (H2, OUT)]   # l4, l5, l6
    names = ["1", "2", "3", "4", "5", "6"]
    params = {}
    keys = jax.random.split(key, 2 * len(dims))
    for i, ((fan_in, fan_out), n) in enumerate(zip(dims, names)):
        bound = 1.0 / jnp.sqrt(jnp.float32(fan_in))
        params["w" + n] = jax.random.uniform(
            keys[2 * i], (fan_in, fan_out),
            minval=-bound, maxval=bound, dtype=jnp.float32)
        params["b" + n] = jax.random.uniform(
            keys[2 * i + 1], (1, fan_out),
            minval=-bound, maxval=bound, dtype=jnp.float32)
    return params


def _reference_forward(state, action, params):
    B = state.shape[0]
    sa = jnp.concatenate([state.reshape(B, -1), action], axis=1)
    h = jax.nn.relu(sa @ params["w1"] + params["b1"])
    h = jax.nn.relu(h @ params["w2"] + params["b2"])
    q1 = h @ params["w3"] + params["b3"]
    g = jax.nn.relu(sa @ params["w4"] + params["b4"])
    g = jax.nn.relu(g @ params["w5"] + params["b5"])
    q2 = g @ params["w6"] + params["b6"]
    return q1, q2


if __name__ == "__main__":
    key = jax.random.PRNGKey(0)
    k_p, k_s, k_a = jax.random.split(key, 3)

    params = init_params(k_p)
    fused = pack_params(params)   # packed once, reused across forward calls

    # Small primary check.
    B = 8
    state = jax.random.normal(k_s, (B, PROCESS_HISTORY, FEAT), dtype=jnp.float32)
    action = jax.random.uniform(k_a, (B, ACTION_DIM), dtype=jnp.float32)

    q1, q2 = critic_forward(state, action, fused)
    jax.block_until_ready((q1, q2))

    r1, r2 = _reference_forward(state, action, params)
    assert q1.shape == (B, 1) and q2.shape == (B, 1)
    assert jnp.allclose(q1, r1, atol=1e-5), "q1 mismatch"
    assert jnp.allclose(q2, r2, atol=1e-5), "q2 mismatch"

    # Non-tile-multiple batch: exercises the ragged final block (no padding)
    # and the >=2-grid-step split (both TCs on v7x).
    B2 = 300
    k_s2, k_a2 = jax.random.split(jax.random.PRNGKey(1))
    state2 = jax.random.normal(k_s2, (B2, PROCESS_HISTORY, FEAT), dtype=jnp.float32)
    action2 = jax.random.uniform(k_a2, (B2, ACTION_DIM), dtype=jnp.float32)
    p1, p2 = critic_forward(state2, action2, fused)
    jax.block_until_ready((p1, p2))
    s1, s2 = _reference_forward(state2, action2, params)
    assert p1.shape == (B2, 1) and p2.shape == (B2, 1)
    assert jnp.allclose(p1, s1, atol=1e-5), "q1 mismatch (tiled)"
    assert jnp.allclose(p2, s2, atol=1e-5), "q2 mismatch (tiled)"

    print("KERNEL_OK")
</pallas_src>

<mosaic_0001>
module attributes {stable_mosaic.version = 11 : i64} {
  func.func @_critic_fused_kernel(%arg0: i32, %arg1: memref<8x4xf32, #tpu.memory_space<vmem>>, %arg2: memref<8x1xf32, #tpu.memory_space<vmem>>, %arg3: memref<4x128xf32, #tpu.memory_space<vmem>>, %arg4: memref<1x128xf32, #tpu.memory_space<vmem>>, %arg5: memref<1x128xf32, #tpu.memory_space<vmem>>, %arg6: memref<128x64xf32, #tpu.memory_space<vmem>>, %arg7: memref<1x64xf32, #tpu.memory_space<vmem>>, %arg8: memref<64x2xf32, #tpu.memory_space<vmem>>, %arg9: memref<1x2xf32, #tpu.memory_space<vmem>>, %arg10: memref<8x1xf32, #tpu.memory_space<vmem>>, %arg11: memref<8x1xf32, #tpu.memory_space<vmem>>) attributes {dimension_semantics = [#tpu.dimension_semantics<parallel>], iteration_bounds = array<i64: 1>, scalar_prefetch = 0 : i64, scratch_operands = 0 : i64, tpu.core_type = #tpu.core_type<tc>, window_params = [{transform_indices = @transform_0, window_bounds = array<i64: 8, 4>}, {transform_indices = @transform_1, window_bounds = array<i64: 8, 1>}, {pipeline_mode = #tpu.pipeline_mode<synchronous>, transform_indices = @transform_2, window_bounds = array<i64: 4, 128>}, {pipeline_mode = #tpu.pipeline_mode<synchronous>, transform_indices = @transform_3, window_bounds = array<i64: 1, 128>}, {pipeline_mode = #tpu.pipeline_mode<synchronous>, transform_indices = @transform_4, window_bounds = array<i64: 1, 128>}, {pipeline_mode = #tpu.pipeline_mode<synchronous>, transform_indices = @transform_5, window_bounds = array<i64: 128, 64>}, {pipeline_mode = #tpu.pipeline_mode<synchronous>, transform_indices = @transform_6, window_bounds = array<i64: 1, 64>}, {pipeline_mode = #tpu.pipeline_mode<synchronous>, transform_indices = @transform_7, window_bounds = array<i64: 64, 2>}, {pipeline_mode = #tpu.pipeline_mode<synchronous>, transform_indices = @transform_8, window_bounds = array<i64: 1, 2>}, {transform_indices = @transform_9, window_bounds = array<i64: 8, 1>}, {transform_indices = @transform_10, window_bounds = array<i64: 8, 1>}]} {
    %c0 = arith.constant 0 : index
    %c0_0 = arith.constant 0 : index
    %0 = vector.load %arg1[%c0, %c0_0] : memref<8x4xf32, #tpu.memory_space<vmem>>, vector<8x4xf32>
    %c0_1 = arith.constant 0 : index
    %c0_2 = arith.constant 0 : index
    %1 = vector.load %arg2[%c0_1, %c0_2] : memref<8x1xf32, #tpu.memory_space<vmem>>, vector<8x1xf32>
    %c0_3 = arith.constant 0 : index
    %c0_4 = arith.constant 0 : index
    %2 = vector.load %arg3[%c0_3, %c0_4] : memref<4x128xf32, #tpu.memory_space<vmem>>, vector<4x128xf32>
    %c0_5 = arith.constant 0 : index
    %c0_6 = arith.constant 0 : index
    %3 = vector.load %arg5[%c0_5, %c0_6] : memref<1x128xf32, #tpu.memory_space<vmem>>, vector<1x128xf32>
    %c0_7 = arith.constant 0 : index
    %c0_8 = arith.constant 0 : index
    %4 = vector.load %arg4[%c0_7, %c0_8] : memref<1x128xf32, #tpu.memory_space<vmem>>, vector<1x128xf32>
    %5 = vector.broadcast %1 : vector<8x1xf32> to vector<8x128xf32>
    %6 = vector.broadcast %4 : vector<1x128xf32> to vector<8x128xf32>
    %7 = arith.mulf %5, %6 : vector<8x128xf32>
    %8 = vector.broadcast %3 : vector<1x128xf32> to vector<8x128xf32>
    %9 = arith.addf %8, %7 : vector<8x128xf32>
    %10 = vector.extract_strided_slice %0 {offsets = [0, 0], sizes = [8, 1], strides = [1, 1]} : vector<8x4xf32> to vector<8x1xf32>
    %11 = vector.extract_strided_slice %2 {offsets = [0, 0], sizes = [1, 128], strides = [1, 1]} : vector<4x128xf32> to vector<1x128xf32>
    %12 = vector.broadcast %10 : vector<8x1xf32> to vector<8x128xf32>
    %13 = vector.broadcast %11 : vector<1x128xf32> to vector<8x128xf32>
    %14 = arith.mulf %12, %13 : vector<8x128xf32>
    %15 = arith.addf %9, %14 : vector<8x128xf32>
    %16 = vector.extract_strided_slice %0 {offsets = [0, 1], sizes = [8, 1], strides = [1, 1]} : vector<8x4xf32> to vector<8x1xf32>
    %17 = vector.extract_strided_slice %2 {offsets = [1, 0], sizes = [1, 128], strides = [1, 1]} : vector<4x128xf32> to vector<1x128xf32>
    %18 = vector.broadcast %16 : vector<8x1xf32> to vector<8x128xf32>
    %19 = vector.broadcast %17 : vector<1x128xf32> to vector<8x128xf32>
    %20 = arith.mulf %18, %19 : vector<8x128xf32>
    %21 = arith.addf %15, %20 : vector<8x128xf32>
    %22 = vector.extract_strided_slice %0 {offsets = [0, 2], sizes = [8, 1], strides = [1, 1]} : vector<8x4xf32> to vector<8x1xf32>
    %23 = vector.extract_strided_slice %2 {offsets = [2, 0], sizes = [1, 128], strides = [1, 1]} : vector<4x128xf32> to vector<1x128xf32>
    %24 = vector.broadcast %22 : vector<8x1xf32> to vector<8x128xf32>
    %25 = vector.broadcast %23 : vector<1x128xf32> to vector<8x128xf32>
    %26 = arith.mulf %24, %25 : vector<8x128xf32>
    %27 = arith.addf %21, %26 : vector<8x128xf32>
    %28 = vector.extract_strided_slice %0 {offsets = [0, 3], sizes = [8, 1], strides = [1, 1]} : vector<8x4xf32> to vector<8x1xf32>
    %29 = vector.extract_strided_slice %2 {offsets = [3, 0], sizes = [1, 128], strides = [1, 1]} : vector<4x128xf32> to vector<1x128xf32>
    %30 = vector.broadcast %28 : vector<8x1xf32> to vector<8x128xf32>
    %31 = vector.broadcast %29 : vector<1x128xf32> to vector<8x128xf32>
    %32 = arith.mulf %30, %31 : vector<8x128xf32>
    %33 = arith.addf %27, %32 : vector<8x128xf32>
    %cst = arith.constant 0.000000e+00 : f32
    %34 = vector.broadcast %cst : f32 to vector<8x128xf32>
    %35 = arith.maximumf %33, %34 : vector<8x128xf32>
    %c0_9 = arith.constant 0 : index
    %c0_10 = arith.constant 0 : index
    %36 = vector.load %arg6[%c0_9, %c0_10] : memref<128x64xf32, #tpu.memory_space<vmem>>, vector<128x64xf32>
    %cst_11 = arith.constant dense<0.000000e+00> : vector<8x64xf32>
    %37 = tpu.matmul %35, %36, %cst_11 {dimension_numbers = #tpu.dot_dimension_numbers<[1], [0], [0], [1], [0, 0, 1, 1], [], []>} : vector<8x128xf32>, vector<128x64xf32>, vector<8x64xf32> -> vector<8x64xf32>
    %c0_12 = arith.constant 0 : index
    %c0_13 = arith.constant 0 : index
    %38 = vector.load %arg7[%c0_12, %c0_13] : memref<1x64xf32, #tpu.memory_space<vmem>>, vector<1x64xf32>
    %39 = vector.broadcast %38 : vector<1x64xf32> to vector<8x64xf32>
    %40 = arith.addf %37, %39 : vector<8x64xf32>
    %cst_14 = arith.constant 0.000000e+00 : f32
    %41 = vector.broadcast %cst_14 : f32 to vector<8x64xf32>
    %42 = arith.maximumf %40, %41 : vector<8x64xf32>
    %c0_15 = arith.constant 0 : index
    %c0_16 = arith.constant 0 : index
    %43 = vector.load %arg8[%c0_15, %c0_16] : memref<64x2xf32, #tpu.memory_space<vmem>>, vector<64x2xf32>
    %cst_17 = arith.constant dense<0.000000e+00> : vector<8x2xf32>
    %44 = tpu.matmul %42, %43, %cst_17 {dimension_numbers = #tpu.dot_dimension_numbers<[1], [0], [0], [1], [0, 0, 1, 1], [], []>} : vector<8x64xf32>, vector<64x2xf32>, vector<8x2xf32> -> vector<8x2xf32>
    %c0_18 = arith.constant 0 : index
    %c0_19 = arith.constant 0 : index
    %45 = vector.load %arg9[%c0_18, %c0_19] : memref<1x2xf32, #tpu.memory_space<vmem>>, vector<1x2xf32>
    %46 = vector.broadcast %45 : vector<1x2xf32> to vector<8x2xf32>
    %47 = arith.addf %44, %46 : vector<8x2xf32>
    %48 = vector.extract_strided_slice %47 {offsets = [0, 0], sizes = [8, 1], strides = [1, 1]} : vector<8x2xf32> to vector<8x1xf32>
    %c0_20 = arith.constant 0 : index
    %c0_21 = arith.constant 0 : index
    %49 = vector.load %arg10[%c0_20, %c0_21] : memref<8x1xf32, #tpu.memory_space<vmem>>, vector<8x1xf32>
    tpu.vector_store %arg10[%c0_20, %c0_21], %48 {strides = array<i32>} : memref<8x1xf32, #tpu.memory_space<vmem>>, vector<8x1xf32>,
    %50 = vector.extract_strided_slice %47 {offsets = [0, 1], sizes = [8, 1], strides = [1, 1]} : vector<8x2xf32> to vector<8x1xf32>
    %c0_22 = arith.constant 0 : index
    %c0_23 = arith.constant 0 : index
    %51 = vector.load %arg11[%c0_22, %c0_23] : memref<8x1xf32, #tpu.memory_space<vmem>>, vector<8x1xf32>
    tpu.vector_store %arg11[%c0_22, %c0_23], %50 {strides = array<i32>} : memref<8x1xf32, #tpu.memory_space<vmem>>, vector<8x1xf32>,
    return
  }
  func.func @transform_0(%arg0: i32) -> (i32, i32) {
    %c0_i32 = arith.constant 0 : i32
    %c0_i32_0 = arith.constant 0 : i32
    return %arg0, %c0_i32 : i32, i32
  }
  func.func @transform_1(%arg0: i32) -> (i32, i32) {
    %c0_i32 = arith.constant 0 : i32
    %c0_i32_0 = arith.constant 0 : i32
    return %arg0, %c0_i32 : i32, i32
  }
  func.func @transform_2(%arg0: i32) -> (i32, i32) {
    %c0_i32 = arith.constant 0 : i32
    %c0_i32_0 = arith.constant 0 : i32
    %c0_i32_1 = arith.constant 0 : i32
    return %c0_i32, %c0_i32_0 : i32, i32
  }
  func.func @transform_3(%arg0: i32) -> (i32, i32) {
    %c0_i32 = arith.constant 0 : i32
    %c0_i32_0 = arith.constant 0 : i32
    %c0_i32_1 = arith.constant 0 : i32
    return %c0_i32, %c0_i32_0 : i32, i32
  }
  func.func @transform_4(%arg0: i32) -> (i32, i32) {
    %c0_i32 = arith.constant 0 : i32
    %c0_i32_0 = arith.constant 0 : i32
    %c0_i32_1 = arith.constant 0 : i32
    return %c0_i32, %c0_i32_0 : i32, i32
  }
  func.func @transform_5(%arg0: i32) -> (i32, i32) {
    %c0_i32 = arith.constant 0 : i32
    %c0_i32_0 = arith.constant 0 : i32
    %c0_i32_1 = arith.constant 0 : i32
    return %c0_i32, %c0_i32_0 : i32, i32
  }
  func.func @transform_6(%arg0: i32) -> (i32, i32) {
    %c0_i32 = arith.constant 0 : i32
    %c0_i32_0 = arith.constant 0 : i32
    %c0_i32_1 = arith.constant 0 : i32
    return %c0_i32, %c0_i32_0 : i32, i32
  }
  func.func @transform_7(%arg0: i32) -> (i32, i32) {
    %c0_i32 = arith.constant 0 : i32
    %c0_i32_0 = arith.constant 0 : i32
    %c0_i32_1 = arith.constant 0 : i32
    return %c0_i32, %c0_i32_0 : i32, i32
  }
  func.func @transform_8(%arg0: i32) -> (i32, i32) {
    %c0_i32 = arith.constant 0 : i32
    %c0_i32_0 = arith.constant 0 : i32
    %c0_i32_1 = arith.constant 0 : i32
    return %c0_i32, %c0_i32_0 : i32, i32
  }
  func.func @transform_9(%arg0: i32) -> (i32, i32) {
    %c0_i32 = arith.constant 0 : i32
    %c0_i32_0 = arith.constant 0 : i32
    return %arg0, %c0_i32 : i32, i32
  }
  func.func @transform_10(%arg0: i32) -> (i32, i32) {
    %c0_i32 = arith.constant 0 : i32
    %c0_i32_0 = arith.constant 0 : i32
    return %arg0, %c0_i32 : i32, i32
  }
}

</mosaic_0001>

<bundles_post_ra>
// kernel: tpu_custom_call.1
= control target key start
LH: loop header
LB: loop body
LE: loop exit
PB: predicated region body
PF: predicated region fallthrough
CT: control target
= control target key end

     0   :  { %v431_v0 = vmov 0   ;;  %v432_v2 = vmov 1   ;;  %v433_v8 = vmov 0.0|0.0   ;;  %v434_v11 = vmov 2   ;;  %s593_s1 = inlined_call_operand.vmem [shape: f32[8,1], index: 1, kind: input, shape index: {}]   ;;  %s594_s0 = inlined_call_operand.vmem [shape: f32[8,4], index: 0, kind: input, shape index: {}]   ;;  %s595_s5 = inlined_call_operand.vmem [shape: f32[128,64], index: 5, kind: input, shape index: {}]   ;;  %s596_s7 = inlined_call_operand.vmem [shape: f32[64,2], index: 7, kind: input, shape index: {}]   ;;  %s597_s3 = inlined_call_operand.vmem [shape: f32[1,128], index: 3, kind: input, shape index: {}]   ;;  %s598_s2 = inlined_call_operand.vmem [shape: f32[4,128], index: 2, kind: input, shape index: {}]   ;;  %s599_s4 = inlined_call_operand.vmem [shape: f32[1,128], index: 4, kind: input, shape index: {}]   ;;  %s600_s6 = inlined_call_operand.vmem [shape: f32[1,64], index: 6, kind: input, shape index: {}]   ;;  %s601_s8 = inlined_call_operand.vmem [shape: f32[1,2], index: 8, kind: input, shape index: {}]   ;;  %s602_s9 = inlined_call_operand.vmem [shape: f32[8,1], index: 9, kind: output, shape index: {0}]   ;;  %s603_s10 = inlined_call_operand.vmem [shape: f32[8,1], index: 10, kind: output, shape index: {1}]  }
   0x1   :  { %427 = vset.pattern.permute.xlu0 %v431_v0  ;;  %v35_v1 = vld [vmem:[%s593_s1] sm:$0xff]  ;;  %428 = vset.pattern.permute.xlu1 %v432_v2  ;;  %v101_v5 = vld [vmem:[%s595_s5 + $0x8] sm:$0xff]  ;;  %v102_v6 = vld [vmem:[%s595_s5 + $0x10] sm:$0xff]  ;;  %v435_v15 = vmov 3   ;;  %vm436_vm0 = vmmov 0   ;;  %v437_v22 = vmov 0.0   ;;  %v63_v41 = vlaneseq }
   0x2   :  { %v34_v3 = vld [vmem:[%s594_s0] sm:$0xff]  ;;  %41 = vperm.xlu0 %427, %v35_v1   ;;  %v103_v7 = vld [vmem:[%s595_s5 + $0x18] sm:$0xff]  ;;  %383 = vmatprep.subr.bf16.mxu0 %v433_v8  ;;  %v105_v13 = vld [vmem:[%s595_s5 + $0x28] sm:$0xff]  ;;  %vm209_vm1 = vcmask 523264   ;;  %vm283_vm2 = vcmask 7168  }
   0x3   :  { %v100_v4 = vld [vmem:[%s595_s5] sm:$0xff]  ;;  %70 = vperm.xlu1 %428, %v34_v3   ;;  %407 = vmatprep.subr.bf16.mxu1 %v433_v8  ;;  %v387_v10 = vpack.c.bf16 %v103_v7, %v102_v6  ;;  %v106_v16 = vld [vmem:[%s595_s5 + $0x30] sm:$0xff]  ;;  %v107_v17 = vld [vmem:[%s595_s5 + $0x38] sm:$0xff]  ;;  %v64_v42 = vshrl.u32 %v63_v41, 7 }
   0x4   :  { %v384_v9 = vpack.c.bf16 %v101_v5, %v100_v4  ;;  %v104_v12 = vld [vmem:[%s595_s5 + $0x20] sm:$0xff]  ;;  %v393_v18 = vpack.c.bf16 %v107_v17, %v106_v16  ;;  %v109_v20 = vld [vmem:[%s595_s5 + $0x48] sm:$0xff]  ;;  %361 = vmatprep.mubr.msk.f32.mxu0 %vm436_vm0, %v437_v22  ;;  %v110_v23 = vld [vmem:[%s595_s5 + $0x50] sm:$0xff]  ;;  %380 = vmatprep.mubr.msk.f32.mxu1 %vm436_vm0, %v437_v22 }
   0x5   :  { %v390_v14 = vpack.c.bf16 %v105_v13, %v104_v12  ;;  %v108_v19 = vld [vmem:[%s595_s5 + $0x40] sm:$0xff]  ;;  %v111_v24 = vld [vmem:[%s595_s5 + $0x58] sm:$0xff]  ;;  %v195_v26 = vld [vmem:[%s596_s7 + $0x8] sm:$0xff]  ;;  %v65_v43 = vsub.s32 0, %v64_v42  ;;  %v75_v46 = vsub.s32 1, %v64_v42  ;;  %v85_v47 = vsub.s32 2, %v64_v42 }
   0x6   :  { %385 = vmatpush3.bf16.msra.mxu0 %v384_v9  ;;  %60 = vperm.xlu0 %427, %v34_v3   ;;  %v396_v21 = vpack.c.bf16 %v109_v20, %v108_v19  ;;  %v194_v25 = vld [vmem:[%s596_s7] sm:$0xff]  ;;  %v196_v27 = vld [vmem:[%s596_s7 + $0x10] sm:$0xff]  ;;  %v197_v29 = vld [vmem:[%s596_s7 + $0x18] sm:$0xff]  ;;  %v399_v30 = vpack.c.bf16 %v111_v24, %v110_v23  ;;  %v95_v53 = vsub.s32 3, %v64_v42 }
   0x7   :  { %429 = vset.pattern.permute.xlu1 %v434_v11  ;;  %386 = vmatprep.subr.bf16.mxu0 %v433_v8  ;;  %v408_v28 = vpack.c.bf16 %v195_v26, %v194_v25  ;;  %v112_v31 = vld [vmem:[%s595_s5 + $0x60] sm:$0xff]  ;;  %v113_v32 = vld [vmem:[%s595_s5 + $0x68] sm:$0xff]  ;;  %v411_v33 = vpack.c.bf16 %v197_v29, %v196_v27  ;;  %v114_v37 = vld [vmem:[%s595_s5 + $0x70] sm:$0xff] }
   0x8   :  { %80 = vperm.xlu1 %429, %v34_v3   ;;  %v198_v34 = vld [vmem:[%s596_s7 + $0x20] sm:$0xff]  ;;  %v199_v35 = vld [vmem:[%s596_s7 + $0x28] sm:$0xff]  ;;  %v402_v36 = vpack.c.bf16 %v113_v32, %v112_v31  ;;  %v115_v38 = vld [vmem:[%s595_s5 + $0x78] sm:$0xff] }
   0x9   :  { %409 = vmatpush3.bf16.msra.mxu1 %v408_v28  ;;  %v414_v39 = vpack.c.bf16 %v199_v35, %v198_v34  ;;  %v405_v40 = vpack.c.bf16 %v115_v38, %v114_v37  ;;  %v298_v44 = vld [vmem:[%s597_s3] ss:$0 sm:$0xff]  ;;  %v200_v6 = vld [vmem:[%s596_s7 + $0x30] sm:$0xff]  ;;  %v201_v7 = vld [vmem:[%s596_s7 + $0x38] sm:$0xff]  ;;  %s438_s7 = smov 127  }
   0xa   :  { %388 = vmatpush3.bf16.msra.mxu0 %v387_v10  ;;  %430 = vset.pattern.permute.xlu0 %v435_v15  ;;  %v36_v45 = vld [vmem:[%s598_s2] sm:$0xf] }
   0xb   :  { %389 = vmatprep.subr.bf16.mxu0 %v433_v8  ;;  %90 = vperm.xlu0 %430, %v34_v3   ;;  %v66_v51 = vrot.slane %v36_v45, %v65_v43  ;;  %v299_v52 = vld [vmem:[%s599_s4] ss:$0 sm:$0xff]  ;;  %v76_v54 = vrot.slane %v36_v45, %v75_v46  ;;  %v86_v55 = vrot.slane %v36_v45, %v85_v47 }
   0xc   :  { %410 = vmatprep.subr.bf16.mxu1 %v433_v8  ;;  %v96_v60 = vrot.slane %v36_v45, %v95_v53  ;;  %v300_v9 = vld [vmem:[%s600_s6] ss:$0 sm:$0xff] }
   0xd   :  { %412 = vmatpush3.bf16.msra.mxu1 %v411_v33 }
   0xe   :  { %391 = vmatpush3.bf16.msra.mxu0 %v390_v14  ;;  %413 = vmatprep.subr.bf16.mxu1 %v433_v8  ;;  %v301_v14 = vld [vmem:[%s601_s8] ss:$0 sm:$0xff] }
   0xf   :  { %392 = vmatprep.subr.bf16.mxu0 %v433_v8 }
  0x11   :  { %415 = vmatpush3.bf16.msra.mxu1 %v414_v39 }
  0x12   :  { %394 = vmatpush3.bf16.msra.mxu0 %v393_v18  ;;  %416 = vmatprep.subr.bf16.mxu1 %v433_v8 }
  0x13   :  { %395 = vmatprep.subr.bf16.mxu0 %v433_v8 }
  0x16   :  { %397 = vmatpush3.bf16.msra.mxu0 %v396_v21 }
  0x17   :  { %398 = vmatprep.subr.bf16.mxu0 %v433_v8 }
  0x1a   :  { %400 = vmatpush3.bf16.msra.mxu0 %v399_v30 }
  0x1b   :  { %401 = vmatprep.subr.bf16.mxu0 %v433_v8 }
  0x1e   :  { %403 = vmatpush3.bf16.msra.mxu0 %v402_v36 }
  0x1f   :  { %404 = vmatprep.subr.bf16.mxu0 %v433_v8  ;;  %v417_v8 = vpack.c.bf16 %v201_v7, %v200_v6 }
  0x21   :  { %418 = vmatpush3.bf16.msra.mxu1 %v417_v8 }
  0x22   :  { %406 = vmatpush3.bf16.msra.mxu0 %v405_v40 }
  0x81   :  { %v42_v48 = vpop.permute.xlu0 %41 }
  0x82   :  { %v71_v49 = vpop.permute.xlu1 %70  ;;  %v50_v50 = vmul.f32 %v298_v44, %v42_v48 }
  0x83   :  { %v77_v61 = vmul.f32 %v76_v54, %v71_v49 }
  0x84   :  { %v57_v57 = vadd.f32 %v299_v52, %v50_v50 }
  0x85   :  { %v61_v56 = vpop.permute.xlu0 %60 }
  0x86   :  { %v67_v58 = vmul.f32 %v66_v51, %v61_v56 }
  0x87   :  { %v81_v59 = vpop.permute.xlu1 %80 }
  0x88   :  { %v68_v62 = vadd.f32 %v67_v58, %v57_v57  ;;  %v87_v63 = vmul.f32 %v86_v55, %v81_v59 }
  0x8a   :  { %v78_v0 = vadd.f32 %v77_v61, %v68_v62  ;;  %v91_v1 = vpop.permute.xlu0 %90 }
  0x8b   :  { %v97_v2 = vmul.f32 %v96_v60, %v91_v1 }
  0x8c   :  { %v88_v3 = vadd.f32 %v87_v63, %v78_v0 }
  0x8e   :  { %v98_v4 = vadd.f32 %v97_v2, %v88_v3 }
  0x90   :  { %v99_v5 = vmax.f32 %v98_v4, 0.0 }
  0x92   :  { %362 = vmatmul.mubr.f32.vlgmr.msra.gmra.mrb[0].mxu0 %v99_v5 }
 0x165   :  { %v189_v10 = vpop.f32.mrb[0].mxu0 }
 0x166   :  { %v190_v11 = vadd.f32 %v300_v9, %v189_v10  ;;  %v363_v12 = vpop.f32.mrb[1].mxu0 }
 0x168   :  { %v193_v13 = vmax.f32 %v190_v11, 0.0 }
 0x16a   :  { %381 = vmatmul.mubr.msk.f32.vlgmr.msra.gmra.mrb[0].mxu1 %vm209_vm1, %v193_v13 }
 0x23d   :  { %v279_v15 = vpop.f32.mrb[0].mxu1 }
 0x23e   :  { %v280_v16 = vadd.f32 %v301_v14, %v279_v15  ;;  %v382_v17 = vpop.f32.mrb[1].mxu1 }
 0x240   :  { %286 = vrot.lane.b32.xlu1 %v280_v16, %s438_s7  ;;  %284 = vst.msk [vmem:[%s602_s9] sm:$0xff] %vm283_vm2, %v280_v16 }
 0x2b2   :  { %v287_v18 = vpop.permute.xlu1 %286 }
 0x2b3   :  { %289 = vst.msk [vmem:[%s603_s10] sm:$0xff] %vm283_vm2, %v287_v18 }

</bundles_post_ra>
